<compile_context>
chip_gen: v7x
topology: tpu7x:2x2x1
jax: 0.10.0
libtpu: 0.0.40
codegen_flags: <defaults>
</compile_context>

<pallas_src>
import functools

import jax
import jax.numpy as jnp
from jax.experimental import pallas as pl
from jax.experimental.pallas import tpu as pltpu

DP = 128  # lane-aligned padded feature width (all real widths are <= 20)

# Chain specs mirroring the PyTorch nn.Sequential definitions.
#   ("linear", in_dim, out_dim, activation)   activation in {"tanh", "none"}
#   ("resblock", size, hidden)                ResNetBlock(size, hidden)
DYN_SPEC = (
    ("linear", 6, 9, "tanh"),
    ("resblock", 9, 9),
    ("linear", 9, 9, "tanh"),
    ("resblock", 9, 9),
    ("linear", 9, 4, "none"),
)
REC_SPEC = (
    ("linear", 8, 11, "tanh"),
    ("linear", 11, 20, "tanh"),
    ("resblock", 20, 20),
    ("linear", 20, 20, "tanh"),
    ("resblock", 20, 20),
    ("linear", 20, 20, "tanh"),
    ("linear", 20, 20, "tanh"),
    ("resblock", 20, 20),
    ("linear", 20, 11, "tanh"),
    ("linear", 11, 1, "none"),
)


def _round_up(x, m):
    return (x + m - 1) // m * m


def chain_linear_dims(spec):
    """(fan_in, fan_out) for every Linear in order (ResNetBlock -> fc1, fc2)."""
    dims = []
    for op in spec:
        if op[0] == "linear":
            dims.append((op[1], op[2]))
        else:  # resblock
            d, h = op[1], op[2]
            dims.append((d, h))
            dims.append((h, d))
    return dims


def chain_ops(spec):
    """Static per-layer op list consumed by the kernel's unrolled loop."""
    ops = []
    for op in spec:
        if op[0] == "linear":
            ops.append(("linear", op[3]))
        else:
            ops.append(("resblock",))
    return tuple(ops)


def chain_io_dims(spec):
    first, last = spec[0], spec[-1]
    in_dim = first[1]
    out_dim = last[2] if last[0] == "linear" else last[1]
    return in_dim, out_dim


def init_chain_params(key, spec):
    """Deterministic nn.Linear-style init: U(-1/sqrt(fan_in), 1/sqrt(fan_in)).
    Weights stored input-major (fan_in, fan_out), i.e. transposed vs PyTorch."""
    dims = chain_linear_dims(spec)
    keys = jax.random.split(key, len(dims))
    params = []
    for k, (fi, fo) in zip(keys, dims):
        kw, kb = jax.random.split(k)
        lim = 1.0 / (fi ** 0.5)
        w = jax.random.uniform(kw, (fi, fo), minval=-lim, maxval=lim, dtype=jnp.float32)
        b = jax.random.uniform(kb, (fo,), minval=-lim, maxval=lim, dtype=jnp.float32)
        params.append((w, b))
    return params


def pack_chain_params(spec, params, dp=DP, mxu_dtype=jnp.bfloat16):
    """Once-per-init packing (hoisted out of the per-call path): zero-pad every
    Linear to (dp, dp), stack, and cast weights to bf16.  Zero padding is exact
    through this network (padded lanes stay exactly 0 through Linear/Tanh/ReLU/+)."""
    dims = chain_linear_dims(spec)
    L = len(dims)
    w_stack = jnp.zeros((L, dp, dp), jnp.float32)
    b_stack = jnp.zeros((L, 1, dp), jnp.float32)
    for l, ((fi, fo), (w, b)) in enumerate(zip(dims, params)):
        w_stack = w_stack.at[l, :fi, :fo].set(w)
        b_stack = b_stack.at[l, 0, :fo].set(b)
    return w_stack.astype(mxu_dtype), b_stack  # weights bf16, biases f32


def mlp_chain_kernel(x_ref, w_ref, b_ref, o_ref, *, ops, mxu_dtype):
    """One batch tile through the whole chain.  Weights/biases are fully resident
    (constant-index blocks); the layer loop is statically unrolled."""
    h = x_ref[...].astype(jnp.float32)  # (tb, DP) f32 intermediates

    def dense(v, li):
        # bf16 MXU inputs, f32 accumulation, f32 bias add.
        return jnp.dot(v.astype(mxu_dtype), w_ref[li],
                       preferred_element_type=jnp.float32) + b_ref[li]

    li = 0
    for op in ops:
        if op[0] == "linear":
            h = dense(h, li)
            li += 1
            if op[1] == "tanh":
                h = jnp.tanh(h)
        else:  # ResNetBlock: fc1 -> ReLU -> fc2 -> +residual -> ReLU
            t = jnp.maximum(dense(h, li), 0.0)
            t = dense(t, li + 1)
            h = jnp.maximum(t + h, 0.0)
            li += 2

    o_ref[...] = h.astype(o_ref.dtype)


def chain_forward(x, w_stack, b_stack, *, spec, tb=512, mxu_dtype=jnp.bfloat16,
                  out_dtype=jnp.float32, min_batch_for_split=512):
    """Run one fused MLP chain.  x: (B, in_dim) f32; w_stack: (L, DP, DP) bf16
    (pre-packed via pack_chain_params); b_stack: (L, 1, DP) f32."""
    B, F = x.shape
    L, dp, _ = w_stack.shape
    ops = chain_ops(spec)
    in_dim, out_dim = chain_io_dims(spec)
    assert F == in_dim, (F, in_dim)
    assert L == len(chain_linear_dims(spec))

    # Batch tile: as large as possible (amortize ~0.35us/grid-step), but guarantee
    # >=2 tiles for v7x megacore once the per-tile work clearly exceeds the
    # per-step overhead.
    tb = max(8, min(tb, _round_up(B, 8)))
    if B >= min_batch_for_split:
        tb = min(tb, _round_up(-(-B // 2), 8))
    Bp = _round_up(B, tb)

    # Per-call work on x only: pad and ship in bf16 (its sole consumer is the MXU).
    xp = jnp.pad(x, ((0, Bp - B), (0, dp - F))).astype(mxu_dtype)

    # Generation-safe VMEM limit from the actual footprint (never request all of
    # v7x's 64 MiB): double-buffered x/out tiles + resident weights/biases + a few
    # live f32 intermediates.
    in_item = jnp.dtype(mxu_dtype).itemsize
    out_item = jnp.dtype(out_dtype).itemsize
    footprint = (2 * tb * dp * in_item          # x tiles (double buffered)
                 + 2 * tb * dp * out_item       # out tiles (double buffered)
                 + L * dp * dp * in_item        # resident weights
                 + L * dp * 4                   # resident biases
                 + 6 * tb * dp * 4)             # live f32 intermediates / spill
    vmem_limit = int(min(32 * 1024 * 1024, max(2 * footprint, 8 * 1024 * 1024)))

    out = pl.pallas_call(
        functools.partial(mlp_chain_kernel, ops=ops, mxu_dtype=mxu_dtype),
        out_shape=jax.ShapeDtypeStruct((Bp, dp), out_dtype),
        grid_spec=pltpu.PrefetchScalarGridSpec(
            num_scalar_prefetch=0,
            grid=(Bp // tb,),                                   # single batch axis
            in_specs=[
                pl.BlockSpec((tb, dp), lambda i: (i, 0)),        # x tile
                pl.BlockSpec((L, dp, dp), lambda i: (0, 0, 0)),  # weights (resident)
                pl.BlockSpec((L, 1, dp), lambda i: (0, 0, 0)),   # biases  (resident)
            ],
            out_specs=pl.BlockSpec((tb, dp), lambda i: (i, 0)),
        ),
        compiler_params=pltpu.CompilerParams(
            dimension_semantics=("parallel",),                   # megacore-shardable
            vmem_limit_bytes=vmem_limit,
        ),
    )(xp, w_stack, b_stack)

    # Single unpad at the very end of the chain (not per block).
    return out[:B, :out_dim]


def chain_reference(x, spec, params):
    """Pure-JAX f32 reference matching the PyTorch forward."""
    h = x
    li = 0
    for op in spec:
        if op[0] == "linear":
            w, b = params[li]
            li += 1
            h = h @ w + b
            if op[3] == "tanh":
                h = jnp.tanh(h)
        else:
            (w1, b1), (w2, b2) = params[li], params[li + 1]
            li += 2
            t = jnp.maximum(h @ w1 + b1, 0.0)
            t = t @ w2 + b2
            h = jnp.maximum(t + h, 0.0)
    return h


if __name__ == "__main__":
    key = jax.random.PRNGKey(0)
    B = 64  # small batch consistent with per-sample latent/space/parameter inputs

    k_dyn, k_rec, kx_dyn, kx_rec = jax.random.split(key, 4)

    dyn_params = init_chain_params(k_dyn, DYN_SPEC)
    rec_params = init_chain_params(k_rec, REC_SPEC)

    # Hoisted once-per-init packing (padding + bf16 cast) — not in the call path.
    dyn_w, dyn_b = pack_chain_params(DYN_SPEC, dyn_params)
    rec_w, rec_b = pack_chain_params(REC_SPEC, rec_params)

    dyn_fwd = jax.jit(functools.partial(chain_forward, spec=DYN_SPEC))
    rec_fwd = jax.jit(functools.partial(chain_forward, spec=REC_SPEC))

    x_dyn = jax.random.normal(kx_dyn, (B, 6), dtype=jnp.float32)
    # TODO(synk): NN.forward composes rec(dyn(x)) but dyn emits 4 features while rec
    #   expects 8; that wiring mismatch is outside the kernel, so rec is exercised on
    #   an independent 8-feature input.
    x_rec = jax.random.normal(kx_rec, (B, 8), dtype=jnp.float32)

    out_dyn = jax.block_until_ready(dyn_fwd(x_dyn, dyn_w, dyn_b))
    out_rec = jax.block_until_ready(rec_fwd(x_rec, rec_w, rec_b))

    ref_dyn = chain_reference(x_dyn, DYN_SPEC, dyn_params)
    ref_rec = chain_reference(x_rec, REC_SPEC, rec_params)

    assert out_dyn.shape == (B, 4), out_dyn.shape
    assert out_rec.shape == (B, 1), out_rec.shape
    # bf16 MXU inputs with f32 accumulation over up to 13 fused layers vs f32 ref.
    assert jnp.allclose(out_dyn, ref_dyn, atol=5e-2, rtol=5e-2), "dyn chain mismatch"
    assert jnp.allclose(out_rec, ref_rec, atol=5e-2, rtol=5e-2), "rec chain mismatch"

    print("KERNEL_OK")
</pallas_src>

<mosaic_0001>
module attributes {stable_mosaic.version = 11 : i64} {
  func.func @mlp_chain_kernel(%arg0: i32, %arg1: memref<64x128xbf16, #tpu.memory_space<vmem>>, %arg2: memref<7x128x128xbf16, #tpu.memory_space<vmem>>, %arg3: memref<7x1x128xf32, #tpu.memory_space<vmem>>, %arg4: memref<64x128xf32, #tpu.memory_space<vmem>>) attributes {dimension_semantics = [#tpu.dimension_semantics<parallel>], iteration_bounds = array<i64: 1>, scalar_prefetch = 0 : i64, scratch_operands = 0 : i64, tpu.core_type = #tpu.core_type<tc>, window_params = [{transform_indices = @transform_0, window_bounds = array<i64: 64, 128>}, {pipeline_mode = #tpu.pipeline_mode<synchronous>, transform_indices = @transform_1, window_bounds = array<i64: 7, 128, 128>}, {pipeline_mode = #tpu.pipeline_mode<synchronous>, transform_indices = @transform_2, window_bounds = array<i64: 7, 1, 128>}, {transform_indices = @transform_3, window_bounds = array<i64: 64, 128>}]} {
    %c0 = arith.constant 0 : index
    %c0_0 = arith.constant 0 : index
    %0 = vector.load %arg1[%c0, %c0_0] : memref<64x128xbf16, #tpu.memory_space<vmem>>, vector<64x128xbf16>
    %1 = arith.extf %0 : vector<64x128xbf16> to vector<64x128xf32>
    %2 = arith.truncf %1 : vector<64x128xf32> to vector<64x128xbf16>
    %c0_1 = arith.constant 0 : index
    %c0_2 = arith.constant 0 : index
    %c0_3 = arith.constant 0 : index
    %3 = vector.load %arg2[%c0_1, %c0_2, %c0_3] : memref<7x128x128xbf16, #tpu.memory_space<vmem>>, vector<1x128x128xbf16>
    %4 = vector.shape_cast %3 : vector<1x128x128xbf16> to vector<128x128xbf16>
    %cst = arith.constant dense<0.000000e+00> : vector<64x128xf32>
    %5 = tpu.matmul %2, %4, %cst {dimension_numbers = #tpu.dot_dimension_numbers<[1], [0], [0], [1], [0, 0, 1, 1], [], []>} : vector<64x128xbf16>, vector<128x128xbf16>, vector<64x128xf32> -> vector<64x128xf32>
    %c0_4 = arith.constant 0 : index
    %c0_5 = arith.constant 0 : index
    %c0_6 = arith.constant 0 : index
    %6 = vector.load %arg3[%c0_4, %c0_5, %c0_6] : memref<7x1x128xf32, #tpu.memory_space<vmem>>, vector<1x1x128xf32>
    %7 = vector.shape_cast %6 : vector<1x1x128xf32> to vector<1x128xf32>
    %8 = vector.broadcast %7 : vector<1x128xf32> to vector<64x128xf32>
    %9 = arith.addf %5, %8 : vector<64x128xf32>
    %10 = math.tanh %9 : vector<64x128xf32>
    %11 = arith.truncf %10 : vector<64x128xf32> to vector<64x128xbf16>
    %c1 = arith.constant 1 : index
    %c0_7 = arith.constant 0 : index
    %c0_8 = arith.constant 0 : index
    %12 = vector.load %arg2[%c1, %c0_7, %c0_8] : memref<7x128x128xbf16, #tpu.memory_space<vmem>>, vector<1x128x128xbf16>
    %13 = vector.shape_cast %12 : vector<1x128x128xbf16> to vector<128x128xbf16>
    %cst_9 = arith.constant dense<0.000000e+00> : vector<64x128xf32>
    %14 = tpu.matmul %11, %13, %cst_9 {dimension_numbers = #tpu.dot_dimension_numbers<[1], [0], [0], [1], [0, 0, 1, 1], [], []>} : vector<64x128xbf16>, vector<128x128xbf16>, vector<64x128xf32> -> vector<64x128xf32>
    %c1_10 = arith.constant 1 : index
    %c0_11 = arith.constant 0 : index
    %c0_12 = arith.constant 0 : index
    %15 = vector.load %arg3[%c1_10, %c0_11, %c0_12] : memref<7x1x128xf32, #tpu.memory_space<vmem>>, vector<1x1x128xf32>
    %16 = vector.shape_cast %15 : vector<1x1x128xf32> to vector<1x128xf32>
    %17 = vector.broadcast %16 : vector<1x128xf32> to vector<64x128xf32>
    %18 = arith.addf %14, %17 : vector<64x128xf32>
    %cst_13 = arith.constant 0.000000e+00 : f32
    %19 = vector.broadcast %cst_13 : f32 to vector<64x128xf32>
    %20 = arith.maximumf %18, %19 : vector<64x128xf32>
    %21 = arith.truncf %20 : vector<64x128xf32> to vector<64x128xbf16>
    %c2 = arith.constant 2 : index
    %c0_14 = arith.constant 0 : index
    %c0_15 = arith.constant 0 : index
    %22 = vector.load %arg2[%c2, %c0_14, %c0_15] : memref<7x128x128xbf16, #tpu.memory_space<vmem>>, vector<1x128x128xbf16>
    %23 = vector.shape_cast %22 : vector<1x128x128xbf16> to vector<128x128xbf16>
    %cst_16 = arith.constant dense<0.000000e+00> : vector<64x128xf32>
    %24 = tpu.matmul %21, %23, %cst_16 {dimension_numbers = #tpu.dot_dimension_numbers<[1], [0], [0], [1], [0, 0, 1, 1], [], []>} : vector<64x128xbf16>, vector<128x128xbf16>, vector<64x128xf32> -> vector<64x128xf32>
    %c2_17 = arith.constant 2 : index
    %c0_18 = arith.constant 0 : index
    %c0_19 = arith.constant 0 : index
    %25 = vector.load %arg3[%c2_17, %c0_18, %c0_19] : memref<7x1x128xf32, #tpu.memory_space<vmem>>, vector<1x1x128xf32>
    %26 = vector.shape_cast %25 : vector<1x1x128xf32> to vector<1x128xf32>
    %27 = vector.broadcast %26 : vector<1x128xf32> to vector<64x128xf32>
    %28 = arith.addf %24, %27 : vector<64x128xf32>
    %29 = arith.addf %28, %10 : vector<64x128xf32>
    %cst_20 = arith.constant 0.000000e+00 : f32
    %30 = vector.broadcast %cst_20 : f32 to vector<64x128xf32>
    %31 = arith.maximumf %29, %30 : vector<64x128xf32>
    %32 = arith.truncf %31 : vector<64x128xf32> to vector<64x128xbf16>
    %c3 = arith.constant 3 : index
    %c0_21 = arith.constant 0 : index
    %c0_22 = arith.constant 0 : index
    %33 = vector.load %arg2[%c3, %c0_21, %c0_22] : memref<7x128x128xbf16, #tpu.memory_space<vmem>>, vector<1x128x128xbf16>
    %34 = vector.shape_cast %33 : vector<1x128x128xbf16> to vector<128x128xbf16>
    %cst_23 = arith.constant dense<0.000000e+00> : vector<64x128xf32>
    %35 = tpu.matmul %32, %34, %cst_23 {dimension_numbers = #tpu.dot_dimension_numbers<[1], [0], [0], [1], [0, 0, 1, 1], [], []>} : vector<64x128xbf16>, vector<128x128xbf16>, vector<64x128xf32> -> vector<64x128xf32>
    %c3_24 = arith.constant 3 : index
    %c0_25 = arith.constant 0 : index
    %c0_26 = arith.constant 0 : index
    %36 = vector.load %arg3[%c3_24, %c0_25, %c0_26] : memref<7x1x128xf32, #tpu.memory_space<vmem>>, vector<1x1x128xf32>
    %37 = vector.shape_cast %36 : vector<1x1x128xf32> to vector<1x128xf32>
    %38 = vector.broadcast %37 : vector<1x128xf32> to vector<64x128xf32>
    %39 = arith.addf %35, %38 : vector<64x128xf32>
    %40 = math.tanh %39 : vector<64x128xf32>
    %41 = arith.truncf %40 : vector<64x128xf32> to vector<64x128xbf16>
    %c4 = arith.constant 4 : index
    %c0_27 = arith.constant 0 : index
    %c0_28 = arith.constant 0 : index
    %42 = vector.load %arg2[%c4, %c0_27, %c0_28] : memref<7x128x128xbf16, #tpu.memory_space<vmem>>, vector<1x128x128xbf16>
    %43 = vector.shape_cast %42 : vector<1x128x128xbf16> to vector<128x128xbf16>
    %cst_29 = arith.constant dense<0.000000e+00> : vector<64x128xf32>
    %44 = tpu.matmul %41, %43, %cst_29 {dimension_numbers = #tpu.dot_dimension_numbers<[1], [0], [0], [1], [0, 0, 1, 1], [], []>} : vector<64x128xbf16>, vector<128x128xbf16>, vector<64x128xf32> -> vector<64x128xf32>
    %c4_30 = arith.constant 4 : index
    %c0_31 = arith.constant 0 : index
    %c0_32 = arith.constant 0 : index
    %45 = vector.load %arg3[%c4_30, %c0_31, %c0_32] : memref<7x1x128xf32, #tpu.memory_space<vmem>>, vector<1x1x128xf32>
    %46 = vector.shape_cast %45 : vector<1x1x128xf32> to vector<1x128xf32>
    %47 = vector.broadcast %46 : vector<1x128xf32> to vector<64x128xf32>
    %48 = arith.addf %44, %47 : vector<64x128xf32>
    %cst_33 = arith.constant 0.000000e+00 : f32
    %49 = vector.broadcast %cst_33 : f32 to vector<64x128xf32>
    %50 = arith.maximumf %48, %49 : vector<64x128xf32>
    %51 = arith.truncf %50 : vector<64x128xf32> to vector<64x128xbf16>
    %c5 = arith.constant 5 : index
    %c0_34 = arith.constant 0 : index
    %c0_35 = arith.constant 0 : index
    %52 = vector.load %arg2[%c5, %c0_34, %c0_35] : memref<7x128x128xbf16, #tpu.memory_space<vmem>>, vector<1x128x128xbf16>
    %53 = vector.shape_cast %52 : vector<1x128x128xbf16> to vector<128x128xbf16>
    %cst_36 = arith.constant dense<0.000000e+00> : vector<64x128xf32>
    %54 = tpu.matmul %51, %53, %cst_36 {dimension_numbers = #tpu.dot_dimension_numbers<[1], [0], [0], [1], [0, 0, 1, 1], [], []>} : vector<64x128xbf16>, vector<128x128xbf16>, vector<64x128xf32> -> vector<64x128xf32>
    %c5_37 = arith.constant 5 : index
    %c0_38 = arith.constant 0 : index
    %c0_39 = arith.constant 0 : index
    %55 = vector.load %arg3[%c5_37, %c0_38, %c0_39] : memref<7x1x128xf32, #tpu.memory_space<vmem>>, vector<1x1x128xf32>
    %56 = vector.shape_cast %55 : vector<1x1x128xf32> to vector<1x128xf32>
    %57 = vector.broadcast %56 : vector<1x128xf32> to vector<64x128xf32>
    %58 = arith.addf %54, %57 : vector<64x128xf32>
    %59 = arith.addf %58, %40 : vector<64x128xf32>
    %cst_40 = arith.constant 0.000000e+00 : f32
    %60 = vector.broadcast %cst_40 : f32 to vector<64x128xf32>
    %61 = arith.maximumf %59, %60 : vector<64x128xf32>
    %62 = arith.truncf %61 : vector<64x128xf32> to vector<64x128xbf16>
    %c6 = arith.constant 6 : index
    %c0_41 = arith.constant 0 : index
    %c0_42 = arith.constant 0 : index
    %63 = vector.load %arg2[%c6, %c0_41, %c0_42] : memref<7x128x128xbf16, #tpu.memory_space<vmem>>, vector<1x128x128xbf16>
    %64 = vector.shape_cast %63 : vector<1x128x128xbf16> to vector<128x128xbf16>
    %cst_43 = arith.constant dense<0.000000e+00> : vector<64x128xf32>
    %65 = tpu.matmul %62, %64, %cst_43 {dimension_numbers = #tpu.dot_dimension_numbers<[1], [0], [0], [1], [0, 0, 1, 1], [], []>} : vector<64x128xbf16>, vector<128x128xbf16>, vector<64x128xf32> -> vector<64x128xf32>
    %c6_44 = arith.constant 6 : index
    %c0_45 = arith.constant 0 : index
    %c0_46 = arith.constant 0 : index
    %66 = vector.load %arg3[%c6_44, %c0_45, %c0_46] : memref<7x1x128xf32, #tpu.memory_space<vmem>>, vector<1x1x128xf32>
    %67 = vector.shape_cast %66 : vector<1x1x128xf32> to vector<1x128xf32>
    %68 = vector.broadcast %67 : vector<1x128xf32> to vector<64x128xf32>
    %69 = arith.addf %65, %68 : vector<64x128xf32>
    %c0_47 = arith.constant 0 : index
    %c0_48 = arith.constant 0 : index
    %70 = vector.load %arg4[%c0_47, %c0_48] : memref<64x128xf32, #tpu.memory_space<vmem>>, vector<64x128xf32>
    tpu.vector_store %arg4[%c0_47, %c0_48], %69 {strides = array<i32>} : memref<64x128xf32, #tpu.memory_space<vmem>>, vector<64x128xf32>,
    return
  }
  func.func @transform_0(%arg0: i32) -> (i32, i32) {
    %c0_i32 = arith.constant 0 : i32
    %c0_i32_0 = arith.constant 0 : i32
    return %arg0, %c0_i32 : i32, i32
  }
  func.func @transform_1(%arg0: i32) -> (i32, i32, i32) {
    %c0_i32 = arith.constant 0 : i32
    %c0_i32_0 = arith.constant 0 : i32
    %c0_i32_1 = arith.constant 0 : i32
    %c0_i32_2 = arith.constant 0 : i32
    return %c0_i32, %c0_i32_0, %c0_i32_1 : i32, i32, i32
  }
  func.func @transform_2(%arg0: i32) -> (i32, i32, i32) {
    %c0_i32 = arith.constant 0 : i32
    %c0_i32_0 = arith.constant 0 : i32
    %c0_i32_1 = arith.constant 0 : i32
    %c0_i32_2 = arith.constant 0 : i32
    return %c0_i32, %c0_i32_0, %c0_i32_1 : i32, i32, i32
  }
  func.func @transform_3(%arg0: i32) -> (i32, i32) {
    %c0_i32 = arith.constant 0 : i32
    %c0_i32_0 = arith.constant 0 : i32
    return %arg0, %c0_i32 : i32, i32
  }
}

</mosaic_0001>

<bundles_post_ra>
// kernel: chain_forward.1
= control target key start
LH: loop header
LB: loop body
LE: loop exit
PB: predicated region body
PF: predicated region fallthrough
CT: control target
= control target key end

     0   :  { %8 = vsyncpa [#allocation3], 0  ;;  %s1586_s12 = smov [#allocation2]   ;;  %s1742_s0 = inlined_call_operand.vmem [shape: bf16[64,128], index: 0, kind: input, shape index: {}]   ;;  %s1743_s1 = inlined_call_operand.hbm [shape: bf16[7,128,128], index: 1, kind: input, shape index: {}]   ;;  %s1744_s2 = inlined_call_operand.vmem [shape: f32[7,1,128], index: 2, kind: input, shape index: {}]   ;;  %s1745_s3 = inlined_call_operand.vmem [shape: f32[64,128], index: 3, kind: output, shape index: {}]  }
   0x1   :  { %s16_s13 = sshll.u32 %s1586_s12, 4  ;;  %s1562_s16 = scalar_lea.hbm %s1743_s1, 7168  ;;  %s17_s13 = int_to_ptr.vmem [resolvable:$true] %s16_s13 }
   0x2   :  { %p1563_p0 = scmp.ne.s32.totalorder %s1743_s1, %s1562_s16  ;;  %p1566_p1 = scmp.lt.u32.totalorder %s1562_s16, %s1743_s1 }
   0x4   :  { %p1568_p2 = pnand %p1566_p1, %p1563_p0 }
   0x6   :  { %1571 = shalt.err (!%p1568_p2)
}
   0x7   :  { %s1572_s21 = scalar_lea.vmem %s17_s13, 7168  ;;  %p1577_p4 = scmp.lt.s32.totalorder %s17_s13, %s17_s13 }
   0x8   :  { %p1573_p3 = scmp.ne.s32.totalorder %s17_s13, %s1572_s21  ;;  %p1578_p5 = scmp.lt.s32.totalorder %s1572_s21, %s1572_s21 }
   0xa   :  { %p1579_p6 = por %p1578_p5, %p1577_p4 }
   0xc   :  { %p1580_p7 = pnand %p1579_p6, %p1573_p3 }
   0xe   :  { %1583 = shalt.err (!%p1580_p7)
}
   0xf   :  { %s1587_s22 = smov 64   ;;  %s1588_s23 = smov 4  }
  0x10   :  { %22 = dma.hbm_to_vmem [thread:$0]  %s1743_s1, 7168, %s17_s13, [#allocation3], %s1587_s22, %s1587_s22, %s1588_s23  }
  0x11   :  { %1584 = dma.done.wait [#allocation3], 7168  }
  0x12   :  { %1585 = vsyncadd [#allocation3], 4294960128  ;;  %v1470_v0 = vld [vmem:[#allocation2] sm:$0xff]   ;;  %v1471_v1 = vld [vmem:[#allocation2 + $0x8] sm:$0xff]  }
  0x13   :  { %1283 = vmatprep.subr.bf16.mxu0 %v1470_v0  ;;  %v1472_v2 = vld [vmem:[#allocation2 + $0x10] sm:$0xff]   ;;  %v1473_v3 = vld [vmem:[#allocation2 + $0x18] sm:$0xff]   ;;  %v1478_v4 = vld [vmem:[%s1742_s0] sm:$0xff]  }
  0x14   :  { %1284 = vmatpush3.bf16.msra.mxu0 %v1470_v0  ;;  %1299 = vmatprep.mubr.bf16.mxu0 %v1478_v4  ;;  %v1474_v5 = vld [vmem:[#allocation2 + $0x20] sm:$0xff]   ;;  %v1483_v7 = vld [vmem:[#allocation2 + $0x48] sm:$0xff]   ;;  %v1484_v9 = vld [vmem:[#allocation2 + $0x50] sm:$0xff]  }
  0x15   :  { %1285 = vmatprep.subr.bf16.mxu0 %v1471_v1  ;;  %v1482_v6 = vld [vmem:[#allocation2 + $0x40] sm:$0xff]   ;;  %v1475_v8 = vld [vmem:[#allocation2 + $0x28] sm:$0xff]   ;;  %v1476_v10 = vld [vmem:[#allocation2 + $0x30] sm:$0xff]  }
  0x16   :  { %1307 = vmatprep.subr.bf16.mxu1 %v1482_v6  ;;  %v1477_v11 = vld [vmem:[#allocation2 + $0x38] sm:$0xff]   ;;  %v1479_v12 = vld [vmem:[%s1742_s0 + $0x8] sm:$0xff]   ;;  %v1480_v13 = vld [vmem:[%s1742_s0 + $0x10] sm:$0xff]  }
  0x17   :  { %1308 = vmatpush3.bf16.msra.mxu1 %v1482_v6  ;;  %v1481_v14 = vld [vmem:[%s1742_s0 + $0x18] sm:$0xff]   ;;  %v1486_v16 = vld [vmem:[#allocation2 + $0x60] sm:$0xff]   ;;  %v1487_v17 = vld [vmem:[#allocation2 + $0x68] sm:$0xff]  }
  0x18   :  { %1286 = vmatpush3.bf16.msra.mxu0 %v1471_v1  ;;  %1309 = vmatprep.subr.bf16.mxu1 %v1483_v7  ;;  %v1485_v15 = vld [vmem:[#allocation2 + $0x58] sm:$0xff]   ;;  %v1488_v18 = vld [vmem:[#allocation2 + $0x70] sm:$0xff]   ;;  %v1490_v20 = vld [vmem:[#allocation2 + $0x80] sm:$0xff]  }
  0x19   :  { %1287 = vmatprep.subr.bf16.mxu0 %v1472_v2  ;;  %v1489_v19 = vld [vmem:[#allocation2 + $0x78] sm:$0xff]   ;;  %v1491_v21 = vld [vmem:[#allocation2 + $0x88] sm:$0xff]   ;;  %v1492_v22 = vld [vmem:[#allocation2 + $0x90] sm:$0xff]  }
  0x1a   :  { %v1493_v23 = vld [vmem:[#allocation2 + $0x98] sm:$0xff]   ;;  %v1494_v24 = vld [vmem:[#allocation2 + $0xa0] sm:$0xff]   ;;  %v1495_v25 = vld [vmem:[#allocation2 + $0xa8] sm:$0xff]  }
  0x1b   :  { %1310 = vmatpush3.bf16.msra.mxu1 %v1483_v7  ;;  %v1126_v26 = vld [vmem:[%s1744_s2] ss:$0 sm:$0xff]  ;;  %v1496_v55 = vld [vmem:[#allocation2 + $0xb0] sm:$0xff]   ;;  %v1497_v56 = vld [vmem:[#allocation2 + $0xb8] sm:$0xff]  }
  0x1c   :  { %1288 = vmatpush3.bf16.msra.mxu0 %v1472_v2  ;;  %1311 = vmatprep.subr.bf16.mxu1 %v1484_v9  ;;  %v1498_v57 = vld [vmem:[#allocation2 + $0xc0] sm:$0xff]   ;;  %v1499_v58 = vld [vmem:[#allocation2 + $0xc8] sm:$0xff]   ;;  %v1500_v59 = vld [vmem:[#allocation2 + $0xd0] sm:$0xff]  }
  0x1d   :  { %1289 = vmatprep.subr.bf16.mxu0 %v1473_v3  ;;  %v1501_v60 = vld [vmem:[#allocation2 + $0xd8] sm:$0xff]   ;;  %v1502_v61 = vld [vmem:[#allocation2 + $0xe0] sm:$0xff]  }
  0x1e   :  { %v1140_v62 = vld [vmem:[%s1744_s2 + $0x1] ss:$0 sm:$0xff] }
  0x1f   :  { %1312 = vmatpush3.bf16.msra.mxu1 %v1484_v9 }
  0x20   :  { %1290 = vmatpush3.bf16.msra.mxu0 %v1473_v3  ;;  %1313 = vmatprep.subr.bf16.mxu1 %v1485_v15 }
  0x21   :  { %1291 = vmatprep.subr.bf16.mxu0 %v1474_v5 }
  0x23   :  { %1314 = vmatpush3.bf16.msra.mxu1 %v1485_v15 }
  0x24   :  { %1292 = vmatpush3.bf16.msra.mxu0 %v1474_v5  ;;  %1315 = vmatprep.subr.bf16.mxu1 %v1486_v16 }
  0x25   :  { %1293 = vmatprep.subr.bf16.mxu0 %v1475_v8 }
  0x27   :  { %1316 = vmatpush3.bf16.msra.mxu1 %v1486_v16 }
  0x28   :  { %1294 = vmatpush3.bf16.msra.mxu0 %v1475_v8  ;;  %1317 = vmatprep.subr.bf16.mxu1 %v1487_v17 }
  0x29   :  { %1295 = vmatprep.subr.bf16.mxu0 %v1476_v10 }
  0x2b   :  { %1318 = vmatpush3.bf16.msra.mxu1 %v1487_v17 }
  0x2c   :  { %1296 = vmatpush3.bf16.msra.mxu0 %v1476_v10  ;;  %1319 = vmatprep.subr.bf16.mxu1 %v1488_v18 }
  0x2d   :  { %1297 = vmatprep.subr.bf16.mxu0 %v1477_v11 }
  0x2f   :  { %1320 = vmatpush3.bf16.msra.mxu1 %v1488_v18 }
  0x30   :  { %1298 = vmatpush3.bf16.msra.mxu0 %v1477_v11  ;;  %1321 = vmatprep.subr.bf16.mxu1 %v1489_v19 }
  0x31   :  { %1331 = vmatprep.subr.bf16.mxu0 %v1490_v20 }
  0x33   :  { %1300 = vmatmul.mubr.bf16.vlgmr.msra.gmra.mrb[0].mxu0 %v1479_v12  ;;  %1322 = vmatpush3.bf16.msra.mxu1 %v1489_v19 }
  0x34   :  { %1303 = vmatprep.mubr.bf16.mxu0 %v1480_v13  ;;  %1332 = vmatpush3.bf16.msra.mxu0 %v1490_v20 }
  0x35   :  { %1333 = vmatprep.subr.bf16.mxu0 %v1491_v21  ;;  %1355 = vmatprep.subr.bf16.mxu1 %v1498_v57 }
  0x38   :  { %1334 = vmatpush3.bf16.msra.mxu0 %v1491_v21 }
  0x39   :  { %1335 = vmatprep.subr.bf16.mxu0 %v1492_v22 }
  0x3b   :  { %1304 = vmatmul.mubr.bf16.gmra.mrb[4].mxu0 %v1481_v14 }
  0x3c   :  { %1336 = vmatpush3.bf16.msra.mxu0 %v1492_v22 }
  0x3d   :  { %1337 = vmatprep.subr.bf16.mxu0 %v1493_v23 }
  0x40   :  { %1338 = vmatpush3.bf16.msra.mxu0 %v1493_v23 }
  0x41   :  { %1339 = vmatprep.subr.bf16.mxu0 %v1494_v24 }
  0x44   :  { %1340 = vmatpush3.bf16.msra.mxu0 %v1494_v24 }
  0x45   :  { %1341 = vmatprep.subr.bf16.mxu0 %v1495_v25 }
  0x48   :  { %1342 = vmatpush3.bf16.msra.mxu0 %v1495_v25 }
  0x49   :  { %1343 = vmatprep.subr.bf16.mxu0 %v1496_v55 }
  0x4c   :  { %1344 = vmatpush3.bf16.msra.mxu0 %v1496_v55 }
  0x4d   :  { %1345 = vmatprep.subr.bf16.mxu0 %v1497_v56 }
  0x50   :  { %1346 = vmatpush3.bf16.msra.mxu0 %v1497_v56 }
 0x106   :  { %v1301_v27 = vpop.f32.mrb[0].mxu0 }
 0x107   :  { %v166_v28 = vpop.f32.mrb[1].mxu0  ;;  %v175_v31 = vadd.f32 %v1301_v27, %v1126_v26  ;;  %v1503_v27 = vld [vmem:[#allocation2 + $0xe8] sm:$0xff]  }
 0x108   :  { %v167_v29 = vadd.f32 %v1126_v26, %v166_v28  ;;  %v1302_v30 = vpop.f32.mrb[2].mxu0  ;;  %v1504_v28 = vld [vmem:[#allocation2 + $0xf0] sm:$0xff]  }
 0x109   :  { %v178_v32 = vadd.f32 %v1302_v30, %v1126_v26  ;;  %v169_v33 = vpop.f32.mrb[3].mxu0  ;;  %v1506_v30 = vld [vmem:[#allocation2 + $0x100] sm:$0xff]  }
 0x10a   :  { %1530 = vtanh.f32 %v167_v29  ;;  %v170_v34 = vadd.f32 %v1126_v26, %v169_v33  ;;  %v1505_v29 = vld [vmem:[#allocation2 + $0xf8] sm:$0xff]   ;;  %1379 = vmatprep.subr.bf16.mxu0 %v1506_v30  ;;  %v1150_v33 = vld [vmem:[%s1744_s2 + $0x2] ss:$0 sm:$0xff] }
 0x10b   :  { %1532 = vtanh.f32 %v178_v32  ;;  %v1508_v32 = vld [vmem:[#allocation2 + $0x110] sm:$0xff]  }
 0x10c   :  { %1534 = vtanh.f32 %v170_v34 }
 0x10d   :  { %1536 = vtanh.f32 %v175_v31  ;;  %v1507_v31 = vld [vmem:[#allocation2 + $0x108] sm:$0xff]  }
 0x10e   :  { %v1305_v35 = vpop.f32.mrb[4].mxu0 }
 0x10f   :  { %v182_v36 = vpop.f32.mrb[5].mxu0  ;;  %v191_v39 = vadd.f32 %v1305_v35, %v1126_v26 }
 0x110   :  { %v183_v37 = vadd.f32 %v1126_v26, %v182_v36  ;;  %v1306_v38 = vpop.f32.mrb[6].mxu0 }
 0x111   :  { %v194_v40 = vadd.f32 %v1306_v38, %v1126_v26  ;;  %v185_v41 = vpop.f32.mrb[7].mxu0 }
 0x112   :  { %1538 = vtanh.f32 %v183_v37  ;;  %v186_v42 = vadd.f32 %v1126_v26, %v185_v41 }
 0x113   :  { %1540 = vtanh.f32 %v194_v40 }
 0x114   :  { %v1636_v43 = vpop.eup %1530  ;;  %1542 = vtanh.f32 %v186_v42 }
 0x115   :  { %v1638_v44 = vpop.eup %1532  ;;  %1544 = vtanh.f32 %v191_v39 }
 0x116   :  { %v1640_v45 = vpop.eup %1534 }
 0x117   :  { %v1642_v46 = vpop.eup %1536  ;;  %v205_v47 = vpack.c.bf16 %v1640_v45, %v1636_v43 }
 0x118   :  { %v206_v48 = vpack.c.bf16 %v1638_v44, %v1642_v46 }
 0x119   :  { %1323 = vmatprep.mubr.bf16.mxu1 %v205_v47 }
 0x11a   :  { %1324 = vmatmul.mubr.bf16.vlgmr.msra.gmra.mrb[0].mxu1 %v206_v48 }
 0x11b   :  { %1356 = vmatpush3.bf16.msra.mxu1 %v1498_v57 }
 0x11c   :  { %v1648_v49 = vpop.eup %1538  ;;  %1357 = vmatprep.subr.bf16.mxu1 %v1499_v58 }
 0x11d   :  { %v1650_v50 = vpop.eup %1540 }
 0x11e   :  { %v1652_v51 = vpop.eup %1542 }
 0x11f   :  { %v1654_v52 = vpop.eup %1544  ;;  %v207_v53 = vpack.c.bf16 %v1652_v51, %v1648_v49  ;;  %1358 = vmatpush3.bf16.msra.mxu1 %v1499_v58 }
 0x120   :  { %v208_v54 = vpack.c.bf16 %v1650_v50, %v1654_v52  ;;  %1359 = vmatprep.subr.bf16.mxu1 %v1500_v59 }
 0x121   :  { %1327 = vmatprep.mubr.bf16.mxu1 %v207_v53 }
 0x122   :  { %1328 = vmatmul.mubr.bf16.gmra.mrb[4].mxu1 %v208_v54 }
 0x123   :  { %1360 = vmatpush3.bf16.msra.mxu1 %v1500_v59 }
 0x124   :  { %1361 = vmatprep.subr.bf16.mxu1 %v1501_v60 }
 0x127   :  { %1362 = vmatpush3.bf16.msra.mxu1 %v1501_v60 }
 0x128   :  { %1363 = vmatprep.subr.bf16.mxu1 %v1502_v61 }
 0x12b   :  { %1364 = vmatpush3.bf16.msra.mxu1 %v1502_v61 }
 0x12c   :  { %1365 = vmatprep.subr.bf16.mxu1 %v1503_v27 }
 0x12f   :  { %1366 = vmatpush3.bf16.msra.mxu1 %v1503_v27 }
 0x130   :  { %1367 = vmatprep.subr.bf16.mxu1 %v1504_v28 }
 0x133   :  { %1368 = vmatpush3.bf16.msra.mxu1 %v1504_v28 }
 0x134   :  { %1369 = vmatprep.subr.bf16.mxu1 %v1505_v29 }
 0x137   :  { %1370 = vmatpush3.bf16.msra.mxu1 %v1505_v29 }
 0x1ed   :  { %v1325_v63 = vpop.f32.mrb[0].mxu1 }
 0x1ee   :  { %v325_v0 = vadd.f32 %v1325_v63, %v1140_v62  ;;  %v316_v1 = vpop.f32.mrb[1].mxu1 }
 0x1ef   :  { %v317_v2 = vadd.f32 %v1140_v62, %v316_v1  ;;  %v1326_v3 = vpop.f32.mrb[2].mxu1 }
 0x1f0   :  { %v328_v4 = vadd.f32 %v1326_v3, %v1140_v62  ;;  %v319_v5 = vpop.f32.mrb[3].mxu1  ;;  %v349_v7 = vmax.f32 %v325_v0, 0.0 }
 0x1f1   :  { %v320_v6 = vadd.f32 %v1140_v62, %v319_v5  ;;  %v347_v9 = vmax.f32 %v317_v2, 0.0 }
 0x1f2   :  { %v350_v8 = vmax.f32 %v328_v4, 0.0 }
 0x1f3   :  { %v348_v10 = vmax.f32 %v320_v6, 0.0 }
 0x1f4   :  { %v356_v11 = vpack.c.bf16 %v350_v8, %v349_v7 }
 0x1f5   :  { %v355_v12 = vpack.c.bf16 %v348_v10, %v347_v9  ;;  %v1329_v13 = vpop.f32.mrb[4].mxu1  ;;  %v1510_v10 = vld [vmem:[#allocation2 + $0x120] sm:$0xff]  }
 0x1f6   :  { %v341_v14 = vadd.f32 %v1329_v13, %v1140_v62  ;;  %v332_v15 = vpop.f32.mrb[5].mxu1  ;;  %v1516_v13 = vld [vmem:[#allocation2 + $0x150] sm:$0xff]  }
 0x1f7   :  { %v333_v16 = vadd.f32 %v1140_v62, %v332_v15  ;;  %v1330_v17 = vpop.f32.mrb[6].mxu1  ;;  %1347 = vmatprep.mubr.bf16.mxu0 %v355_v12  ;;  %v1515_v12 = vld [vmem:[#allocation2 + $0x148] sm:$0xff]   ;;  %v1518_v15 = vld [vmem:[#allocation2 + $0x160] sm:$0xff]  }
 0x1f8   :  { %v344_v18 = vadd.f32 %v1330_v17, %v1140_v62  ;;  %v335_v19 = vpop.f32.mrb[7].mxu1  ;;  %1348 = vmatmul.mubr.bf16.vlgmr.msra.gmra.mrb[8].mxu0 %v356_v11  ;;  %v353_v21 = vmax.f32 %v341_v14, 0.0  ;;  %v1514_v11 = vld [vmem:[#allocation2 + $0x140] sm:$0xff]   ;;  %v1517_v14 = vld [vmem:[#allocation2 + $0x158] sm:$0xff]  }
 0x1f9   :  { %v336_v20 = vadd.f32 %v1140_v62, %v335_v19  ;;  %v351_v23 = vmax.f32 %v333_v16, 0.0  ;;  %1380 = vmatpush3.bf16.msra.mxu0 %v1506_v30  ;;  %1403 = vmatprep.subr.bf16.mxu1 %v1514_v11  ;;  %v1519_v16 = vld [vmem:[#allocation2 + $0x168] sm:$0xff]   ;;  %v1160_v17 = vld [vmem:[%s1744_s2 + $0x3] ss:$0 sm:$0xff] }
 0x1fa   :  { %v354_v22 = vmax.f32 %v344_v18, 0.0  ;;  %1381 = vmatprep.subr.bf16.mxu0 %v1507_v31 }
 0x1fb   :  { %v352_v24 = vmax.f32 %v336_v20, 0.0 }
 0x1fc   :  { %v358_v25 = vpack.c.bf16 %v354_v22, %v353_v21 }
 0x1fd   :  { %v357_v26 = vpack.c.bf16 %v352_v24, %v351_v23  ;;  %1382 = vmatpush3.bf16.msra.mxu0 %v1507_v31 }
 0x1fe   :  { %1383 = vmatprep.subr.bf16.mxu0 %v1508_v32 }
 0x1ff   :  { %1351 = vmatprep.mubr.bf16.mxu0 %v357_v26 }
 0x200   :  { %1352 = vmatmul.mubr.bf16.gmra.mrb[12].mxu0 %v358_v25 }
 0x201   :  { %1384 = vmatpush3.bf16.msra.mxu0 %v1508_v32 }
 0x2cb   :  { %v1349_v34 = vpop.f32.mrb[8].mxu0 }
 0x2cc   :  { %v475_v35 = vadd.f32 %v1349_v34, %v1150_v33  ;;  %v466_v36 = vpop.f32.mrb[9].mxu0 }
 0x2cd   :  { %v467_v37 = vadd.f32 %v1150_v33, %v466_v36  ;;  %v1350_v38 = vpop.f32.mrb[10].mxu0 }
 0x2ce   :  { %v499_v39 = vadd.f32 %v1642_v46, %v475_v35  ;;  %v478_v40 = vadd.f32 %v1350_v38, %v1150_v33  ;;  %v469_v41 = vpop.f32.mrb[11].mxu0 }
 0x2cf   :  { %v497_v42 = vadd.f32 %v1636_v43, %v467_v37  ;;  %v470_v47 = vadd.f32 %v1150_v33, %v469_v41 }
 0x2d0   :  { %v500_v48 = vadd.f32 %v1638_v44, %v478_v40  ;;  %v507_v54 = vmax.f32 %v499_v39, 0.0 }
 0x2d1   :  { %v498_v53 = vadd.f32 %v1640_v45, %v470_v47  ;;  %v505_v56 = vmax.f32 %v497_v42, 0.0 }
 0x2d2   :  { %v508_v55 = vmax.f32 %v500_v48, 0.0 }
 0x2d3   :  { %v506_v57 = vmax.f32 %v498_v53, 0.0  ;;  %v1353_v58 = vpop.f32.mrb[12].mxu0 }
 0x2d4   :  { %v514_v59 = vpack.c.bf16 %v508_v55, %v507_v54  ;;  %v491_v60 = vadd.f32 %v1353_v58, %v1150_v33  ;;  %v482_v61 = vpop.f32.mrb[13].mxu0  ;;  %v1520_v54 = vld [vmem:[#allocation2 + $0x170] sm:$0xff]   ;;  %v1521_v55 = vld [vmem:[#allocation2 + $0x178] sm:$0xff]  }
 0x2d5   :  { %v483_v62 = vadd.f32 %v1150_v33, %v482_v61  ;;  %v1354_v63 = vpop.f32.mrb[14].mxu0  ;;  %v513_v46 = vpack.c.bf16 %v506_v57, %v505_v56  ;;  %v1522_v56 = vld [vmem:[#allocation2 + $0x180] sm:$0xff]   ;;  %v1523_v57 = vld [vmem:[#allocation2 + $0x188] sm:$0xff]   ;;  %v1524_v58 = vld [vmem:[#allocation2 + $0x190] sm:$0xff]  }
 0x2d6   :  { %v503_v0 = vadd.f32 %v1654_v52, %v491_v60  ;;  %v494_v1 = vadd.f32 %v1354_v63, %v1150_v33  ;;  %v485_v43 = vpop.f32.mrb[15].mxu0  ;;  %v1509_v52 = vld [vmem:[#allocation2 + $0x118] sm:$0xff]   ;;  %v1526_v60 = vld [vmem:[#allocation2 + $0x1a0] sm:$0xff]  }
 0x2d7   :  { %v501_v2 = vadd.f32 %v1648_v49, %v483_v62  ;;  %v486_v44 = vadd.f32 %v1150_v33, %v485_v43  ;;  %1371 = vmatprep.mubr.bf16.mxu1 %v513_v46  ;;  %1385 = vmatprep.subr.bf16.mxu0 %v1509_v52  ;;  %v1511_v49 = vld [vmem:[#allocation2 + $0x128] sm:$0xff]   ;;  %v1170_v61 = vld [vmem:[%s1744_s2 + $0x4] ss:$0 sm:$0xff] }
 0x2d8   :  { %v504_v45 = vadd.f32 %v1650_v50, %v494_v1  ;;  %1372 = vmatmul.mubr.bf16.vlgmr.msra.gmra.mrb[8].mxu1 %v514_v59  ;;  %v511_v4 = vmax.f32 %v503_v0, 0.0  ;;  %1386 = vmatpush3.bf16.msra.mxu0 %v1509_v52  ;;  %v1512_v50 = vld [vmem:[#allocation2 + $0x130] sm:$0xff]   ;;  %v1525_v59 = vld [vmem:[#allocation2 + $0x198] sm:$0xff]  }
 0x2d9   :  { %v502_v3 = vadd.f32 %v1652_v51, %v486_v44  ;;  %v509_v6 = vmax.f32 %v501_v2, 0.0  ;;  %1387 = vmatprep.subr.bf16.mxu0 %v1510_v10  ;;  %v1513_v51 = vld [vmem:[#allocation2 + $0x138] sm:$0xff]   ;;  %1404 = vmatpush3.bf16.msra.mxu1 %v1514_v11 }
 0x2da   :  { %v512_v5 = vmax.f32 %v504_v45, 0.0  ;;  %1405 = vmatprep.subr.bf16.mxu1 %v1515_v12 }
 0x2db   :  { %v510_v7 = vmax.f32 %v502_v3, 0.0 }
 0x2dc   :  { %v516_v8 = vpack.c.bf16 %v512_v5, %v511_v4  ;;  %1388 = vmatpush3.bf16.msra.mxu0 %v1510_v10 }
 0x2dd   :  { %v515_v9 = vpack.c.bf16 %v510_v7, %v509_v6  ;;  %1389 = vmatprep.subr.bf16.mxu0 %v1511_v49  ;;  %1406 = vmatpush3.bf16.msra.mxu1 %v1515_v12 }
 0x2de   :  { %1407 = vmatprep.subr.bf16.mxu1 %v1516_v13 }
 0x2df   :  { %1375 = vmatprep.mubr.bf16.mxu1 %v515_v9 }
 0x2e0   :  { %1376 = vmatmul.mubr.bf16.gmra.mrb[12].mxu1 %v516_v8  ;;  %1390 = vmatpush3.bf16.msra.mxu0 %v1511_v49 }
 0x2e1   :  { %1391 = vmatprep.subr.bf16.mxu0 %v1512_v50  ;;  %1408 = vmatpush3.bf16.msra.mxu1 %v1516_v13 }
 0x2e2   :  { %1409 = vmatprep.subr.bf16.mxu1 %v1517_v14 }
 0x2e4   :  { %1392 = vmatpush3.bf16.msra.mxu0 %v1512_v50 }
 0x2e5   :  { %1393 = vmatprep.subr.bf16.mxu0 %v1513_v51  ;;  %1410 = vmatpush3.bf16.msra.mxu1 %v1517_v14 }
 0x2e6   :  { %1411 = vmatprep.subr.bf16.mxu1 %v1518_v15 }
 0x2e8   :  { %1394 = vmatpush3.bf16.msra.mxu0 %v1513_v51 }
 0x2e9   :  { %1412 = vmatpush3.bf16.msra.mxu1 %v1518_v15  ;;  %1427 = vmatprep.subr.bf16.mxu0 %v1522_v56 }
 0x2ea   :  { %1413 = vmatprep.subr.bf16.mxu1 %v1519_v16 }
 0x2ed   :  { %1414 = vmatpush3.bf16.msra.mxu1 %v1519_v16 }
 0x2ee   :  { %1415 = vmatprep.subr.bf16.mxu1 %v1520_v54 }
 0x2f1   :  { %1416 = vmatpush3.bf16.msra.mxu1 %v1520_v54 }
 0x2f2   :  { %1417 = vmatprep.subr.bf16.mxu1 %v1521_v55 }
 0x2f5   :  { %1418 = vmatpush3.bf16.msra.mxu1 %v1521_v55 }
 0x2f6   :  { %1451 = vmatprep.subr.bf16.mxu1 %v1522_v56 }
 0x3ab   :  { %v1373_v18 = vpop.f32.mrb[8].mxu1 }
 0x3ac   :  { %v624_v19 = vpop.f32.mrb[9].mxu1  ;;  %v633_v22 = vadd.f32 %v1373_v18, %v1160_v17  ;;  %v1527_v18 = vld [vmem:[#allocation2 + $0x1a8] sm:$0xff]  }
 0x3ad   :  { %v625_v20 = vadd.f32 %v1160_v17, %v624_v19  ;;  %v1374_v21 = vpop.f32.mrb[10].mxu1  ;;  %v1528_v19 = vld [vmem:[#allocation2 + $0x1b0] sm:$0xff]  }
 0x3ae   :  { %v636_v23 = vadd.f32 %v1374_v21, %v1160_v17  ;;  %v627_v24 = vpop.f32.mrb[11].mxu1  ;;  %v1180_v21 = vld [vmem:[%s1744_s2 + $0x5] ss:$0 sm:$0xff] }
 0x3af   :  { %1546 = vtanh.f32 %v625_v20  ;;  %v628_v25 = vadd.f32 %v1160_v17, %v627_v24  ;;  %v1529_v20 = vld [vmem:[#allocation2 + $0x1b8] sm:$0xff]  }
 0x3b0   :  { %1548 = vtanh.f32 %v636_v23 }
 0x3b1   :  { %1550 = vtanh.f32 %v628_v25 }
 0x3b2   :  { %1552 = vtanh.f32 %v633_v22 }
 0x3b3   :  { %v1377_v26 = vpop.f32.mrb[12].mxu1 }
 0x3b4   :  { %v640_v27 = vpop.f32.mrb[13].mxu1  ;;  %v649_v30 = vadd.f32 %v1377_v26, %v1160_v17 }
 0x3b5   :  { %v641_v28 = vadd.f32 %v1160_v17, %v640_v27  ;;  %v1378_v29 = vpop.f32.mrb[14].mxu1 }
 0x3b6   :  { %v652_v31 = vadd.f32 %v1378_v29, %v1160_v17  ;;  %v643_v32 = vpop.f32.mrb[15].mxu1 }
 0x3b7   :  { %1554 = vtanh.f32 %v641_v28  ;;  %v644_v33 = vadd.f32 %v1160_v17, %v643_v32 }
 0x3b8   :  { %1556 = vtanh.f32 %v652_v31 }
 0x3b9   :  { %v1677_v34 = vpop.eup %1546  ;;  %1558 = vtanh.f32 %v644_v33 }
 0x3ba   :  { %v1679_v35 = vpop.eup %1548  ;;  %1560 = vtanh.f32 %v649_v30 }
 0x3bb   :  { %v1681_v36 = vpop.eup %1550 }
 0x3bc   :  { %v1683_v37 = vpop.eup %1552  ;;  %v663_v38 = vpack.c.bf16 %v1681_v36, %v1677_v34 }
 0x3bd   :  { %v664_v39 = vpack.c.bf16 %v1679_v35, %v1683_v37 }
 0x3be   :  { %1395 = vmatprep.mubr.bf16.mxu0 %v663_v38 }
 0x3bf   :  { %1396 = vmatmul.mubr.bf16.vlgmr.msra.gmra.mrb[16].mxu0 %v664_v39 }
 0x3c0   :  { %1428 = vmatpush3.bf16.msra.mxu0 %v1522_v56 }
 0x3c1   :  { %v1689_v40 = vpop.eup %1554  ;;  %1429 = vmatprep.subr.bf16.mxu0 %v1523_v57 }
 0x3c2   :  { %v1691_v41 = vpop.eup %1556 }
 0x3c3   :  { %v1693_v42 = vpop.eup %1558 }
 0x3c4   :  { %v1695_v47 = vpop.eup %1560  ;;  %v665_v48 = vpack.c.bf16 %v1693_v42, %v1689_v40  ;;  %1430 = vmatpush3.bf16.msra.mxu0 %v1523_v57 }
 0x3c5   :  { %v666_v53 = vpack.c.bf16 %v1691_v41, %v1695_v47  ;;  %1431 = vmatprep.subr.bf16.mxu0 %v1524_v58 }
 0x3c6   :  { %1399 = vmatprep.mubr.bf16.mxu0 %v665_v48 }
 0x3c7   :  { %1400 = vmatmul.mubr.bf16.gmra.mrb[20].mxu0 %v666_v53 }
 0x3c8   :  { %1432 = vmatpush3.bf16.msra.mxu0 %v1524_v58 }
 0x3c9   :  { %1433 = vmatprep.subr.bf16.mxu0 %v1525_v59 }
 0x3cc   :  { %1434 = vmatpush3.bf16.msra.mxu0 %v1525_v59 }
 0x3cd   :  { %1435 = vmatprep.subr.bf16.mxu0 %v1526_v60 }
 0x3d0   :  { %1436 = vmatpush3.bf16.msra.mxu0 %v1526_v60 }
 0x3d1   :  { %1437 = vmatprep.subr.bf16.mxu0 %v1527_v18 }
 0x3d4   :  { %1438 = vmatpush3.bf16.msra.mxu0 %v1527_v18 }
 0x3d5   :  { %1439 = vmatprep.subr.bf16.mxu0 %v1528_v19 }
 0x3d8   :  { %1440 = vmatpush3.bf16.msra.mxu0 %v1528_v19 }
 0x3d9   :  { %1441 = vmatprep.subr.bf16.mxu0 %v1529_v20 }
 0x3dc   :  { %1442 = vmatpush3.bf16.msra.mxu0 %v1529_v20 }
 0x492   :  { %v1397_v62 = vpop.f32.mrb[16].mxu0 }
 0x493   :  { %v783_v63 = vadd.f32 %v1397_v62, %v1170_v61  ;;  %v774_v46 = vpop.f32.mrb[17].mxu0 }
 0x494   :  { %v775_v0 = vadd.f32 %v1170_v61, %v774_v46  ;;  %v1398_v1 = vpop.f32.mrb[18].mxu0 }
 0x495   :  { %v786_v43 = vadd.f32 %v1398_v1, %v1170_v61  ;;  %v777_v2 = vpop.f32.mrb[19].mxu0  ;;  %v807_v45 = vmax.f32 %v783_v63, 0.0 }
 0x496   :  { %v778_v44 = vadd.f32 %v1170_v61, %v777_v2  ;;  %v805_v4 = vmax.f32 %v775_v0, 0.0 }
 0x497   :  { %v808_v3 = vmax.f32 %v786_v43, 0.0 }
 0x498   :  { %v806_v5 = vmax.f32 %v778_v44, 0.0 }
 0x499   :  { %v814_v6 = vpack.c.bf16 %v808_v3, %v807_v45 }
 0x49a   :  { %v813_v7 = vpack.c.bf16 %v806_v5, %v805_v4  ;;  %v1401_v8 = vpop.f32.mrb[20].mxu0 }
 0x49b   :  { %v799_v9 = vadd.f32 %v1401_v8, %v1170_v61  ;;  %v790_v52 = vpop.f32.mrb[21].mxu0 }
 0x49c   :  { %v791_v10 = vadd.f32 %v1170_v61, %v790_v52  ;;  %v1402_v49 = vpop.f32.mrb[22].mxu0  ;;  %1419 = vmatprep.mubr.bf16.mxu1 %v813_v7 }
 0x49d   :  { %v802_v50 = vadd.f32 %v1402_v49, %v1170_v61  ;;  %v793_v51 = vpop.f32.mrb[23].mxu0  ;;  %1420 = vmatmul.mubr.bf16.vlgmr.msra.gmra.mrb[16].mxu1 %v814_v6  ;;  %v811_v12 = vmax.f32 %v799_v9, 0.0 }
 0x49e   :  { %v794_v11 = vadd.f32 %v1170_v61, %v793_v51  ;;  %1459 = vmatpush3.bf16.msra.mxu1 %v1522_v56  ;;  %v809_v14 = vmax.f32 %v791_v10, 0.0 }
 0x49f   :  { %v812_v13 = vmax.f32 %v802_v50, 0.0  ;;  %1452 = vmatprep.subr.bf16.mxu1 %v1523_v57 }
 0x4a0   :  { %v810_v15 = vmax.f32 %v794_v11, 0.0 }
 0x4a1   :  { %v816_v16 = vpack.c.bf16 %v812_v13, %v811_v12 }
 0x4a2   :  { %v815_v17 = vpack.c.bf16 %v810_v15, %v809_v14  ;;  %1460 = vmatpush3.bf16.msra.mxu1 %v1523_v57 }
 0x4a3   :  { %1453 = vmatprep.subr.bf16.mxu1 %v1524_v58 }
 0x4a4   :  { %1423 = vmatprep.mubr.bf16.mxu1 %v815_v17 }
 0x4a5   :  { %1424 = vmatmul.mubr.bf16.gmra.mrb[20].mxu1 %v816_v16 }
 0x4a6   :  { %1461 = vmatpush3.bf16.msra.mxu1 %v1524_v58 }
 0x4a7   :  { %1454 = vmatprep.subr.bf16.mxu1 %v1525_v59 }
 0x4aa   :  { %1462 = vmatpush3.bf16.msra.mxu1 %v1525_v59 }
 0x4ab   :  { %1455 = vmatprep.subr.bf16.mxu1 %v1526_v60 }
 0x4ae   :  { %1463 = vmatpush3.bf16.msra.mxu1 %v1526_v60 }
 0x4af   :  { %1456 = vmatprep.subr.bf16.mxu1 %v1527_v18 }
 0x4b2   :  { %1464 = vmatpush3.bf16.msra.mxu1 %v1527_v18 }
 0x4b3   :  { %1457 = vmatprep.subr.bf16.mxu1 %v1528_v19 }
 0x4b6   :  { %1465 = vmatpush3.bf16.msra.mxu1 %v1528_v19 }
 0x4b7   :  { %1458 = vmatprep.subr.bf16.mxu1 %v1529_v20 }
 0x4ba   :  { %1466 = vmatpush3.bf16.msra.mxu1 %v1529_v20 }
 0x570   :  { %v1421_v22 = vpop.f32.mrb[16].mxu1 }
 0x571   :  { %v933_v23 = vadd.f32 %v1421_v22, %v1180_v21  ;;  %v924_v24 = vpop.f32.mrb[17].mxu1 }
 0x572   :  { %v925_v25 = vadd.f32 %v1180_v21, %v924_v24  ;;  %v1422_v26 = vpop.f32.mrb[18].mxu1 }
 0x573   :  { %v957_v27 = vadd.f32 %v1683_v37, %v933_v23  ;;  %v936_v28 = vadd.f32 %v1422_v26, %v1180_v21  ;;  %v927_v29 = vpop.f32.mrb[19].mxu1 }
 0x574   :  { %v955_v30 = vadd.f32 %v1677_v34, %v925_v25  ;;  %v928_v31 = vadd.f32 %v1180_v21, %v927_v29 }
 0x575   :  { %v958_v32 = vadd.f32 %v1679_v35, %v936_v28  ;;  %v965_v38 = vmax.f32 %v957_v27, 0.0 }
 0x576   :  { %v956_v33 = vadd.f32 %v1681_v36, %v928_v31  ;;  %v963_v48 = vmax.f32 %v955_v30, 0.0 }
 0x577   :  { %v966_v39 = vmax.f32 %v958_v32, 0.0 }
 0x578   :  { %v964_v53 = vmax.f32 %v956_v33, 0.0  ;;  %v1425_v54 = vpop.f32.mrb[20].mxu1 }
 0x579   :  { %v972_v55 = vpack.c.bf16 %v966_v39, %v965_v38  ;;  %v949_v56 = vadd.f32 %v1425_v54, %v1180_v21  ;;  %v940_v57 = vpop.f32.mrb[21].mxu1 }
 0x57a   :  { %v941_v58 = vadd.f32 %v1180_v21, %v940_v57  ;;  %v1426_v59 = vpop.f32.mrb[22].mxu1  ;;  %v971_v37 = vpack.c.bf16 %v964_v53, %v963_v48 }
 0x57b   :  { %v961_v60 = vadd.f32 %v1695_v47, %v949_v56  ;;  %v952_v61 = vadd.f32 %v1426_v59, %v1180_v21  ;;  %v943_v34 = vpop.f32.mrb[23].mxu1  ;;  %v1190_v47 = vld [vmem:[%s1744_s2 + $0x6] ss:$0 sm:$0xff] }
 0x57c   :  { %v959_v62 = vadd.f32 %v1689_v40, %v941_v58  ;;  %v944_v35 = vadd.f32 %v1180_v21, %v943_v34  ;;  %1443 = vmatprep.mubr.bf16.mxu0 %v971_v37 }
 0x57d   :  { %v962_v36 = vadd.f32 %v1691_v41, %v952_v61  ;;  %1444 = vmatmul.mubr.bf16.vlgmr.msra.gmra.mrb[24].mxu0 %v972_v55  ;;  %v969_v46 = vmax.f32 %v961_v60, 0.0 }
 0x57e   :  { %v960_v63 = vadd.f32 %v1693_v42, %v944_v35  ;;  %v967_v1 = vmax.f32 %v959_v62, 0.0 }
 0x57f   :  { %v970_v0 = vmax.f32 %v962_v36, 0.0 }
 0x580   :  { %v968_v43 = vmax.f32 %v960_v63, 0.0 }
 0x581   :  { %v974_v2 = vpack.c.bf16 %v970_v0, %v969_v46 }
 0x582   :  { %v973_v44 = vpack.c.bf16 %v968_v43, %v967_v1 }
 0x584   :  { %1447 = vmatprep.mubr.bf16.mxu1 %v973_v44 }
 0x585   :  { %1448 = vmatmul.mubr.bf16.vlgmr.msra.gmra.mrb[24].mxu1 %v974_v2 }
 0x650   :  { %v1445_v40 = vpop.f32.mrb[24].mxu0 }
 0x651   :  { %v1091_v45 = vadd.f32 %v1445_v40, %v1190_v47  ;;  %v1082_v3 = vpop.f32.mrb[25].mxu0 }
 0x652   :  { %v1083_v4 = vadd.f32 %v1190_v47, %v1082_v3  ;;  %v1446_v41 = vpop.f32.mrb[26].mxu0 }
 0x653   :  { %1115 = vst [vmem:[%s1745_s3 + $0x10] sm:$0xff] %v1091_v45  ;;  %v1094_v42 = vadd.f32 %v1446_v41, %v1190_v47  ;;  %v1085_v5 = vpop.f32.mrb[27].mxu0 }
 0x654   :  { %1113 = vst [vmem:[%s1745_s3] sm:$0xff] %v1083_v4  ;;  %v1086_v6 = vadd.f32 %v1190_v47, %v1085_v5 }
 0x655   :  { %1116 = vst [vmem:[%s1745_s3 + $0x18] sm:$0xff] %v1094_v42 }
 0x656   :  { %1114 = vst [vmem:[%s1745_s3 + $0x8] sm:$0xff] %v1086_v6 }
 0x658   :  { %v1449_v7 = vpop.f32.mrb[24].mxu1 }
 0x659   :  { %v1107_v8 = vadd.f32 %v1449_v7, %v1190_v47  ;;  %v1098_v9 = vpop.f32.mrb[25].mxu1 }
 0x65a   :  { %v1099_v52 = vadd.f32 %v1190_v47, %v1098_v9  ;;  %v1450_v10 = vpop.f32.mrb[26].mxu1 }
 0x65b   :  { %1119 = vst [vmem:[%s1745_s3 + $0x30] sm:$0xff] %v1107_v8  ;;  %v1110_v49 = vadd.f32 %v1450_v10, %v1190_v47  ;;  %v1101_v50 = vpop.f32.mrb[27].mxu1 }
 0x65c   :  { %1117 = vst [vmem:[%s1745_s3 + $0x20] sm:$0xff] %v1099_v52  ;;  %v1102_v51 = vadd.f32 %v1190_v47, %v1101_v50 }
 0x65d   :  { %1120 = vst [vmem:[%s1745_s3 + $0x38] sm:$0xff] %v1110_v49 }
 0x65e   :  { %1118 = vst [vmem:[%s1745_s3 + $0x28] sm:$0xff] %v1102_v51 }
 0x65f   :  { %1125 = vsyncpa [#allocation3], 1 }

</bundles_post_ra>
